<compile_context>
chip_gen: v7x
topology: tpu7x:2x2x1
jax: 0.10.0
libtpu: 0.0.40
codegen_flags: <defaults>
</compile_context>

<pallas_src>
import numpy as np
import jax
import jax.numpy as jnp
from jax.experimental import pallas as pl
from jax.experimental.pallas import tpu as pltpu


def _round_up(x: int, m: int) -> int:
    return (x + m - 1) // m * m


def _pick_batch_tile(B: int, tb_max: int = 256) -> tuple[int, int]:
    """Pick (TB, Bp): TB a multiple of 8 (<= tb_max), Bp a multiple of TB.

    Minimizes padded batch rows (padded rows burn real MXU cycles) and, when
    it costs no extra padding, splits the batch into >=2 grid steps so the
    "parallel" axis can be sharded across TensorCores (megacore / v7x)."""
    Bp8 = _round_up(B, 8)
    if Bp8 <= tb_max:
        # Whole batch fits one MXU-height tile; split in two when free.
        if Bp8 >= 16 and Bp8 % 16 == 0:
            return Bp8 // 2, Bp8
        return Bp8, Bp8
    best_tb, best_bp = tb_max, _round_up(B, tb_max)
    for tb in range(tb_max, 7, -8):      # prefer larger TB on ties
        bp = _round_up(B, tb)
        if bp < best_bp:
            best_tb, best_bp = tb, bp
    return best_tb, best_bp


def _make_bases(Lx: int, Ly: int, n: int, max_shift: int, Fp: int, out_pad: int):
    """Forward bases (L, 2Fp) = [cos | -sin] and inverse bases
    INVc = w*cos/n, INVs = -w*sin/n, each (Fp, out_pad), with the circular
    shift concat baked into the column order (col k -> time (k-max_shift)%n).
    Padded rows/cols are exactly zero (exactly representable in bf16)."""
    F = n // 2 + 1

    def fwd(L):
        t = np.arange(L)[:, None].astype(np.float64)
        f = np.arange(F)[None, :].astype(np.float64)
        ang = 2.0 * np.pi * t * f / n
        M = np.zeros((L, 2 * Fp), np.float32)
        M[:, :F] = np.cos(ang)
        M[:, Fp:Fp + F] = -np.sin(ang)
        return M

    CSx = fwd(Lx)
    CSy = fwd(Ly)

    out_len = 2 * max_shift + 1
    w = np.full((F,), 2.0, np.float64)           # irfft half-spectrum weights
    w[0] = 1.0
    if n % 2 == 0:
        w[-1] = 1.0
    k = np.arange(out_len)
    tt = (k - max_shift) % n                     # output column -> cc time index
    f = np.arange(F)[:, None].astype(np.float64)
    ang = 2.0 * np.pi * f * tt[None, :] / n      # (F, out_len)
    INVc = np.zeros((Fp, out_pad), np.float32)
    INVs = np.zeros((Fp, out_pad), np.float32)
    INVc[:F, :out_len] = (w[:, None] * np.cos(ang)) / n
    INVs[:F, :out_len] = -(w[:, None] * np.sin(ang)) / n
    return CSx, CSy, INVc, INVs


def make_gcc_kernel(Fp: int, epsilon: float):
    def gcc_kernel(x_ref, y_ref, csx_ref, csy_ref, invc_ref, invs_ref, o_ref):
        # Forward real DFT: one fused matmul per signal -> [Re | Im] columns
        # (f32 accumulation regardless of input/basis dtype).
        XF = jnp.dot(x_ref[...], csx_ref[...], preferred_element_type=jnp.float32)
        YF = jnp.dot(y_ref[...], csy_ref[...], preferred_element_type=jnp.float32)
        Xr, Xi = XF[:, :Fp], XF[:, Fp:]
        Yr, Yi = YF[:, :Fp], YF[:, Fp:]

        # Gxy = X * conj(Y)
        Gr = Xr * Yr + Xi * Yi
        Gi = Xi * Yr - Xr * Yi

        # PHAT: phi = 1 / (|Gxy| + eps)  (EUP approx reciprocal + 1 Newton step;
        # the Newton VALU ops are free filler under MXU slack at realistic n).
        denom = jnp.sqrt(Gr * Gr + Gi * Gi) + epsilon
        phi = pl.reciprocal(denom, approx=True)
        phi = phi * (2.0 - denom * phi)

        # Weighted spectrum straight into two accumulating inverse matmuls
        # (no scratch round-trip).  Circular-shift concat is baked into the
        # inverse basis columns -> single lane-dense output block.
        Wr = (Gr * phi).astype(invc_ref.dtype)
        Wi = (Gi * phi).astype(invs_ref.dtype)
        o_ref[...] = (
            jnp.dot(Wr, invc_ref[...], preferred_element_type=jnp.float32)
            + jnp.dot(Wi, invs_ref[...], preferred_element_type=jnp.float32))

    return gcc_kernel


def gcc_phat(x, y, *, max_tau=None, epsilon=1e-3, compute_dtype=jnp.bfloat16):
    """GCC forward (dim=2, filt='phat', beta=None) for x:(B,Lx), y:(B,Ly).

    compute_dtype: dtype of the DFT bases and signal tiles fed to the MXU
    (accumulation is always f32).  bfloat16 (default) is ~3-6x faster;
    float32 matches the FFT reference to ~1e-4."""
    B, Lx = x.shape
    By, Ly = y.shape
    assert B == By, "batch mismatch"
    n = Lx + Ly
    F = n // 2 + 1
    max_shift = n // 2
    if max_tau is not None:
        max_shift = int(np.minimum(max_tau, max_shift))
    out_len = 2 * max_shift + 1

    # Lane/sublane aligned padded sizes and batch tiling.
    Fp = _round_up(F, 128)
    out_pad = _round_up(out_len, 128)
    TB, Bp = _pick_batch_tile(B)

    CSx, CSy, INVc, INVs = _make_bases(Lx, Ly, n, max_shift, Fp, out_pad)
    CSx = jnp.asarray(CSx, dtype=compute_dtype)
    CSy = jnp.asarray(CSy, dtype=compute_dtype)
    INVc = jnp.asarray(INVc, dtype=compute_dtype)
    INVs = jnp.asarray(INVs, dtype=compute_dtype)

    xf = x.astype(compute_dtype)
    yf = y.astype(compute_dtype)
    if Bp != B:
        xf = jnp.zeros((Bp, Lx), compute_dtype).at[:B].set(xf)
        yf = jnp.zeros((Bp, Ly), compute_dtype).at[:B].set(yf)

    kernel = make_gcc_kernel(Fp, float(epsilon))

    # Cost model + VMEM budget (bases resident, tiles double-buffered).
    itemsize = jnp.dtype(compute_dtype).itemsize
    flops = 2 * Bp * (Lx + Ly) * (2 * Fp) + 2 * Bp * (2 * Fp) * out_pad
    bytes_accessed = (itemsize * (Bp * (Lx + Ly) + (Lx + Ly) * 2 * Fp
                                  + 2 * Fp * out_pad)
                      + 4 * Bp * out_pad)
    bases_bytes = (Lx + Ly) * 2 * Fp * itemsize + 2 * Fp * out_pad * itemsize
    tile_bytes = TB * (Lx + Ly) * itemsize + TB * out_pad * 4
    interm_bytes = 10 * TB * Fp * 4                     # f32 elementwise temps
    vmem_need = 2 * (bases_bytes + tile_bytes) + interm_bytes
    vmem_limit = int(min(64 * 1024 * 1024,              # safe on all chips (v7x = 64 MiB)
                         max(vmem_need, 16 * 1024 * 1024)))

    out = pl.pallas_call(
        kernel,
        out_shape=jax.ShapeDtypeStruct((Bp, out_pad), jnp.float32),
        grid=(Bp // TB,),
        in_specs=[
            pl.BlockSpec((TB, Lx), lambda b: (b, 0)),           # x batch tile
            pl.BlockSpec((TB, Ly), lambda b: (b, 0)),           # y batch tile
            pl.BlockSpec((Lx, 2 * Fp), lambda b: (0, 0)),       # fwd basis x (resident)
            pl.BlockSpec((Ly, 2 * Fp), lambda b: (0, 0)),       # fwd basis y (resident)
            pl.BlockSpec((Fp, out_pad), lambda b: (0, 0)),      # inverse cos basis
            pl.BlockSpec((Fp, out_pad), lambda b: (0, 0)),      # inverse sin basis
        ],
        out_specs=pl.BlockSpec((TB, out_pad), lambda b: (b, 0)),
        compiler_params=pltpu.CompilerParams(
            dimension_semantics=("parallel",),
            vmem_limit_bytes=vmem_limit),
        cost_estimate=pl.CostEstimate(
            flops=flops,
            transcendentals=2 * Bp * Fp,
            bytes_accessed=bytes_accessed),
    )(xf, yf, CSx, CSy, INVc, INVs)

    return out[:B, :out_len]


def _reference_gcc_phat(x, y, epsilon=1e-3):
    """Pure-JAX reference mirroring the PyTorch module (phat, dim=2, beta=None)."""
    n = x.shape[-1] + y.shape[-1]
    X = jnp.fft.rfft(x, n=n)
    Y = jnp.fft.rfft(y, n=n)
    Gxy = X * jnp.conj(Y)
    phi = 1.0 / (jnp.abs(Gxy) + epsilon)
    cc = jnp.fft.irfft(Gxy * phi, n)
    max_shift = n // 2
    return jnp.concatenate((cc[:, -max_shift:], cc[:, :max_shift + 1]), axis=-1)


if __name__ == "__main__":
    key = jax.random.PRNGKey(0)
    kx, ky = jax.random.split(key)
    B, L = 2, 16
    x = jax.random.normal(kx, (B, L), jnp.float32)
    y = jax.random.normal(ky, (B, L), jnp.float32)

    ref = _reference_gcc_phat(x, y)

    # Exact-math (f32) path: tight tolerance against the fp32 FFT reference.
    out32 = jax.block_until_ready(gcc_phat(x, y, compute_dtype=jnp.float32))
    assert out32.shape == (B, L + L + 1), out32.shape
    np.testing.assert_allclose(np.asarray(out32), np.asarray(ref),
                               rtol=2e-3, atol=2e-3)

    # Fast default (bf16 bases/tiles, f32 accumulation): error comes only from
    # bf16 input/basis rounding, well inside 1e-2 for PHAT-normalized outputs.
    out16 = jax.block_until_ready(gcc_phat(x, y))
    assert out16.shape == (B, L + L + 1), out16.shape
    np.testing.assert_allclose(np.asarray(out16), np.asarray(ref),
                               rtol=1e-2, atol=1e-2)

    print("KERNEL_OK")
</pallas_src>

<mosaic_0001>
module attributes {stable_mosaic.version = 11 : i64} {
  func.func @gcc_kernel(%arg0: i32, %arg1: memref<8x16xf32, #tpu.memory_space<vmem>>, %arg2: memref<8x16xf32, #tpu.memory_space<vmem>>, %arg3: memref<16x256xf32, #tpu.memory_space<vmem>>, %arg4: memref<16x256xf32, #tpu.memory_space<vmem>>, %arg5: memref<128x128xf32, #tpu.memory_space<vmem>>, %arg6: memref<128x128xf32, #tpu.memory_space<vmem>>, %arg7: memref<8x128xf32, #tpu.memory_space<vmem>>) attributes {dimension_semantics = [#tpu.dimension_semantics<parallel>], iteration_bounds = array<i64: 1>, scalar_prefetch = 0 : i64, scratch_operands = 0 : i64, tpu.core_type = #tpu.core_type<tc>, window_params = [{transform_indices = @transform_0, window_bounds = array<i64: 8, 16>}, {transform_indices = @transform_1, window_bounds = array<i64: 8, 16>}, {pipeline_mode = #tpu.pipeline_mode<synchronous>, transform_indices = @transform_2, window_bounds = array<i64: 16, 256>}, {pipeline_mode = #tpu.pipeline_mode<synchronous>, transform_indices = @transform_3, window_bounds = array<i64: 16, 256>}, {pipeline_mode = #tpu.pipeline_mode<synchronous>, transform_indices = @transform_4, window_bounds = array<i64: 128, 128>}, {pipeline_mode = #tpu.pipeline_mode<synchronous>, transform_indices = @transform_5, window_bounds = array<i64: 128, 128>}, {transform_indices = @transform_6, window_bounds = array<i64: 8, 128>}]} {
    %c0 = arith.constant 0 : index
    %c0_0 = arith.constant 0 : index
    %0 = vector.load %arg1[%c0, %c0_0] : memref<8x16xf32, #tpu.memory_space<vmem>>, vector<8x16xf32>
    %c0_1 = arith.constant 0 : index
    %c0_2 = arith.constant 0 : index
    %1 = vector.load %arg3[%c0_1, %c0_2] : memref<16x256xf32, #tpu.memory_space<vmem>>, vector<16x256xf32>
    %cst = arith.constant dense<0.000000e+00> : vector<8x256xf32>
    %2 = tpu.matmul %0, %1, %cst {dimension_numbers = #tpu.dot_dimension_numbers<[1], [0], [0], [1], [0, 0, 1, 1], [], []>} : vector<8x16xf32>, vector<16x256xf32>, vector<8x256xf32> -> vector<8x256xf32>
    %c0_3 = arith.constant 0 : index
    %c0_4 = arith.constant 0 : index
    %3 = vector.load %arg2[%c0_3, %c0_4] : memref<8x16xf32, #tpu.memory_space<vmem>>, vector<8x16xf32>
    %c0_5 = arith.constant 0 : index
    %c0_6 = arith.constant 0 : index
    %4 = vector.load %arg4[%c0_5, %c0_6] : memref<16x256xf32, #tpu.memory_space<vmem>>, vector<16x256xf32>
    %cst_7 = arith.constant dense<0.000000e+00> : vector<8x256xf32>
    %5 = tpu.matmul %3, %4, %cst_7 {dimension_numbers = #tpu.dot_dimension_numbers<[1], [0], [0], [1], [0, 0, 1, 1], [], []>} : vector<8x16xf32>, vector<16x256xf32>, vector<8x256xf32> -> vector<8x256xf32>
    %6 = vector.extract_strided_slice %2 {offsets = [0, 0], sizes = [8, 128], strides = [1, 1]} : vector<8x256xf32> to vector<8x128xf32>
    %7 = vector.extract_strided_slice %2 {offsets = [0, 128], sizes = [8, 128], strides = [1, 1]} : vector<8x256xf32> to vector<8x128xf32>
    %8 = vector.extract_strided_slice %5 {offsets = [0, 0], sizes = [8, 128], strides = [1, 1]} : vector<8x256xf32> to vector<8x128xf32>
    %9 = vector.extract_strided_slice %5 {offsets = [0, 128], sizes = [8, 128], strides = [1, 1]} : vector<8x256xf32> to vector<8x128xf32>
    %10 = arith.mulf %6, %8 : vector<8x128xf32>
    %11 = arith.mulf %7, %9 : vector<8x128xf32>
    %12 = arith.addf %10, %11 : vector<8x128xf32>
    %13 = arith.mulf %7, %8 : vector<8x128xf32>
    %14 = arith.mulf %6, %9 : vector<8x128xf32>
    %15 = arith.subf %13, %14 : vector<8x128xf32>
    %16 = arith.mulf %12, %12 : vector<8x128xf32>
    %17 = arith.mulf %15, %15 : vector<8x128xf32>
    %18 = arith.addf %16, %17 : vector<8x128xf32>
    %19 = math.sqrt %18 : vector<8x128xf32>
    %cst_8 = arith.constant 1.000000e-03 : f32
    %20 = vector.broadcast %cst_8 : f32 to vector<8x128xf32>
    %21 = arith.addf %19, %20 : vector<8x128xf32>
    %22 = tpu.reciprocal %21 {approx = true} : vector<8x128xf32> -> vector<8x128xf32>
    %23 = arith.mulf %21, %22 : vector<8x128xf32>
    %cst_9 = arith.constant 2.000000e+00 : f32
    %24 = vector.broadcast %cst_9 : f32 to vector<8x128xf32>
    %25 = arith.subf %24, %23 : vector<8x128xf32>
    %26 = arith.mulf %22, %25 : vector<8x128xf32>
    %27 = arith.mulf %12, %26 : vector<8x128xf32>
    %28 = arith.mulf %15, %26 : vector<8x128xf32>
    %c0_10 = arith.constant 0 : index
    %c0_11 = arith.constant 0 : index
    %29 = vector.load %arg5[%c0_10, %c0_11] : memref<128x128xf32, #tpu.memory_space<vmem>>, vector<128x128xf32>
    %cst_12 = arith.constant dense<0.000000e+00> : vector<8x128xf32>
    %30 = tpu.matmul %27, %29, %cst_12 {dimension_numbers = #tpu.dot_dimension_numbers<[1], [0], [0], [1], [0, 0, 1, 1], [], []>} : vector<8x128xf32>, vector<128x128xf32>, vector<8x128xf32> -> vector<8x128xf32>
    %c0_13 = arith.constant 0 : index
    %c0_14 = arith.constant 0 : index
    %31 = vector.load %arg6[%c0_13, %c0_14] : memref<128x128xf32, #tpu.memory_space<vmem>>, vector<128x128xf32>
    %cst_15 = arith.constant dense<0.000000e+00> : vector<8x128xf32>
    %32 = tpu.matmul %28, %31, %cst_15 {dimension_numbers = #tpu.dot_dimension_numbers<[1], [0], [0], [1], [0, 0, 1, 1], [], []>} : vector<8x128xf32>, vector<128x128xf32>, vector<8x128xf32> -> vector<8x128xf32>
    %33 = arith.addf %30, %32 : vector<8x128xf32>
    %c0_16 = arith.constant 0 : index
    %c0_17 = arith.constant 0 : index
    %34 = vector.load %arg7[%c0_16, %c0_17] : memref<8x128xf32, #tpu.memory_space<vmem>>, vector<8x128xf32>
    tpu.vector_store %arg7[%c0_16, %c0_17], %33 {strides = array<i32>} : memref<8x128xf32, #tpu.memory_space<vmem>>, vector<8x128xf32>,
    return
  }
  func.func @transform_0(%arg0: i32) -> (i32, i32) {
    %c0_i32 = arith.constant 0 : i32
    %c0_i32_0 = arith.constant 0 : i32
    return %arg0, %c0_i32 : i32, i32
  }
  func.func @transform_1(%arg0: i32) -> (i32, i32) {
    %c0_i32 = arith.constant 0 : i32
    %c0_i32_0 = arith.constant 0 : i32
    return %arg0, %c0_i32 : i32, i32
  }
  func.func @transform_2(%arg0: i32) -> (i32, i32) {
    %c0_i32 = arith.constant 0 : i32
    %c0_i32_0 = arith.constant 0 : i32
    %c0_i32_1 = arith.constant 0 : i32
    return %c0_i32, %c0_i32_0 : i32, i32
  }
  func.func @transform_3(%arg0: i32) -> (i32, i32) {
    %c0_i32 = arith.constant 0 : i32
    %c0_i32_0 = arith.constant 0 : i32
    %c0_i32_1 = arith.constant 0 : i32
    return %c0_i32, %c0_i32_0 : i32, i32
  }
  func.func @transform_4(%arg0: i32) -> (i32, i32) {
    %c0_i32 = arith.constant 0 : i32
    %c0_i32_0 = arith.constant 0 : i32
    %c0_i32_1 = arith.constant 0 : i32
    return %c0_i32, %c0_i32_0 : i32, i32
  }
  func.func @transform_5(%arg0: i32) -> (i32, i32) {
    %c0_i32 = arith.constant 0 : i32
    %c0_i32_0 = arith.constant 0 : i32
    %c0_i32_1 = arith.constant 0 : i32
    return %c0_i32, %c0_i32_0 : i32, i32
  }
  func.func @transform_6(%arg0: i32) -> (i32, i32) {
    %c0_i32 = arith.constant 0 : i32
    %c0_i32_0 = arith.constant 0 : i32
    return %arg0, %c0_i32 : i32, i32
  }
}

</mosaic_0001>

<bundles_post_ra>
// kernel: tpu_custom_call.1
= control target key start
LH: loop header
LB: loop body
LE: loop exit
PB: predicated region body
PF: predicated region fallthrough
CT: control target
= control target key end

     0   :  { %11 = vsyncpa [#allocation3], 0  ;;  %s979_s0 = inlined_call_operand.hbm [shape: f32[8,16], index: 0, kind: input, shape index: {}]   ;;  %s980_s1 = inlined_call_operand.hbm [shape: f32[8,16], index: 1, kind: input, shape index: {}]   ;;  %s981_s2 = inlined_call_operand.hbm [shape: f32[16,256], index: 2, kind: input, shape index: {}]   ;;  %s982_s3 = inlined_call_operand.hbm [shape: f32[16,256], index: 3, kind: input, shape index: {}]   ;;  %s983_s4 = inlined_call_operand.hbm [shape: f32[128,128], index: 4, kind: input, shape index: {}]   ;;  %s984_s5 = inlined_call_operand.hbm [shape: f32[128,128], index: 5, kind: input, shape index: {}]   ;;  %s985_s6 = inlined_call_operand.hbm [shape: f32[8,128], index: 6, kind: output, shape index: {}]  }
   0x1   :  { %12 = vsyncpa [#allocation6], 0 }
   0x2   :  { %13 = vsyncpa [#allocation9], 0 }
   0x3   :  { %14 = vsyncpa [#allocation12], 0 }
   0x4   :  { %15 = vsyncpa [#allocation4], 0  ;;  %s820_s21 = smov [#allocation5]   ;;  %s656_s25 = scalar_lea.hbm %s980_s1, 128 }
   0x5   :  { %s32_s22 = sshll.u32 %s820_s21, 4  ;;  %p657_p0 = scmp.ne.s32.totalorder %s980_s1, %s656_s25  ;;  %s33_s22 = int_to_ptr.vmem [resolvable:$true] %s32_s22 }
   0x6   :  { %p660_p1 = scmp.lt.u32.totalorder %s656_s25, %s980_s1 }
   0x8   :  { %p662_p2 = pnand %p660_p1, %p657_p0 }
   0xa   :  { %665 = shalt.err (!%p662_p2)
}
   0xb   :  { %s666_s30 = scalar_lea.vmem %s33_s22, 128  ;;  %p671_p4 = scmp.lt.s32.totalorder %s33_s22, %s33_s22 }
   0xc   :  { %p667_p3 = scmp.ne.s32.totalorder %s33_s22, %s666_s30  ;;  %p672_p5 = scmp.lt.s32.totalorder %s666_s30, %s666_s30 }
   0xe   :  { %p673_p6 = por %p672_p5, %p671_p4 }
  0x10   :  { %p674_p7 = pnand %p673_p6, %p667_p3 }
  0x12   :  { %677 = shalt.err (!%p674_p7)
}
  0x13   :  { %35 = dma.hbm_to_vmem [thread:$0]  %s980_s1, 128, %s33_s22, [#allocation6]  }
  0x14   :  { %s821_s9 = smov [#allocation8]   ;;  %s822_s11 = smov [#allocation2]  }
  0x15   :  { %s53_s10 = sshll.u32 %s821_s9, 4  ;;  %s22_s12 = sshll.u32 %s822_s11, 4  ;;  %s54_s10 = int_to_ptr.vmem [resolvable:$true] %s53_s10  ;;  %s23_s12 = int_to_ptr.vmem [resolvable:$true] %s22_s12 }
  0x16   :  { %s678_s15 = scalar_lea.hbm %s982_s3, 512 }
  0x17   :  { %p679_p8 = scmp.ne.s32.totalorder %s982_s3, %s678_s15  ;;  %p682_p9 = scmp.lt.u32.totalorder %s678_s15, %s982_s3 }
  0x19   :  { %p684_p10 = pnand %p682_p9, %p679_p8 }
  0x1b   :  { %687 = shalt.err (!%p684_p10)
}
  0x1c   :  { %s688_s1 = scalar_lea.vmem %s54_s10, 512  ;;  %p693_p12 = scmp.lt.s32.totalorder %s54_s10, %s54_s10 }
  0x1d   :  { %p689_p11 = scmp.ne.s32.totalorder %s54_s10, %s688_s1  ;;  %p694_p13 = scmp.lt.s32.totalorder %s688_s1, %s688_s1 }
  0x1f   :  { %p695_p0 = por %p694_p13, %p693_p12 }
  0x21   :  { %p696_p1 = pnand %p695_p0, %p689_p11 }
  0x23   :  { %699 = shalt.err (!%p696_p1)
}
  0x24   :  { %s823_s20 = smov 256   ;;  %s824_s21 = smov 16  }
  0x25   :  { %59 = dma.hbm_to_vmem [thread:$0]  %s982_s3, 512, %s54_s10, [#allocation9], %s823_s20, %s823_s20, %s824_s21  }
  0x26   :  { %s700_s26 = scalar_lea.hbm %s979_s0, 128 }
  0x27   :  { %p701_p2 = scmp.ne.s32.totalorder %s979_s0, %s700_s26  ;;  %p704_p3 = scmp.lt.u32.totalorder %s700_s26, %s979_s0 }
  0x29   :  { %p706_p4 = pnand %p704_p3, %p701_p2 }
  0x2b   :  { %709 = shalt.err (!%p706_p4)
}
  0x2c   :  { %s710_s7 = scalar_lea.vmem %s23_s12, 128  ;;  %p715_p6 = scmp.lt.s32.totalorder %s23_s12, %s23_s12 }
  0x2d   :  { %p711_p5 = scmp.ne.s32.totalorder %s23_s12, %s710_s7  ;;  %p716_p7 = scmp.lt.s32.totalorder %s710_s7, %s710_s7 }
  0x2f   :  { %p717_p8 = por %p716_p7, %p715_p6 }
  0x31   :  { %p718_p9 = pnand %p717_p8, %p711_p5 }
  0x33   :  { %721 = shalt.err (!%p718_p9)
}
  0x34   :  { %25 = dma.hbm_to_vmem [thread:$0]  %s979_s0, 128, %s23_s12, [#allocation3]  }
  0x35   :  { %s825_s9 = smov [#allocation7]   ;;  %s826_s11 = smov [#allocation10]  }
  0x36   :  { %s41_s10 = sshll.u32 %s825_s9, 4  ;;  %s65_s13 = sshll.u32 %s826_s11, 4  ;;  %s42_s10 = int_to_ptr.vmem [resolvable:$true] %s41_s10  ;;  %s66_s13 = int_to_ptr.vmem [resolvable:$true] %s65_s13 }
  0x37   :  { %s722_s16 = scalar_lea.hbm %s981_s2, 512 }
  0x38   :  { %p723_p10 = scmp.ne.s32.totalorder %s981_s2, %s722_s16  ;;  %p726_p11 = scmp.lt.u32.totalorder %s722_s16, %s981_s2 }
  0x3a   :  { %p728_p12 = pnand %p726_p11, %p723_p10 }
  0x3c   :  { %731 = shalt.err (!%p728_p12)
}
  0x3d   :  { %s732_s0 = scalar_lea.vmem %s42_s10, 512  ;;  %p737_p0 = scmp.lt.s32.totalorder %s42_s10, %s42_s10 }
  0x3e   :  { %p733_p13 = scmp.ne.s32.totalorder %s42_s10, %s732_s0  ;;  %p738_p1 = scmp.lt.s32.totalorder %s732_s0, %s732_s0 }
  0x40   :  { %p739_p2 = por %p738_p1, %p737_p0 }
  0x42   :  { %p740_p3 = pnand %p739_p2, %p733_p13 }
  0x44   :  { %743 = shalt.err (!%p740_p3)
}
  0x45   :  { %47 = dma.hbm_to_vmem [thread:$0]  %s981_s2, 512, %s42_s10, [#allocation6], %s823_s20, %s823_s20, %s824_s21  }
  0x46   :  { %s744_s25 = scalar_lea.hbm %s983_s4, 2048 }
  0x47   :  { %p745_p4 = scmp.ne.s32.totalorder %s983_s4, %s744_s25  ;;  %p748_p5 = scmp.lt.u32.totalorder %s744_s25, %s983_s4 }
  0x49   :  { %p750_p6 = pnand %p748_p5, %p745_p4 }
  0x4b   :  { %753 = shalt.err (!%p750_p6)
}
  0x4c   :  { %s754_s30 = scalar_lea.vmem %s66_s13, 2048  ;;  %p759_p8 = scmp.lt.s32.totalorder %s66_s13, %s66_s13 }
  0x4d   :  { %p755_p7 = scmp.ne.s32.totalorder %s66_s13, %s754_s30  ;;  %p760_p9 = scmp.lt.s32.totalorder %s754_s30, %s754_s30 }
  0x4f   :  { %p761_p10 = por %p760_p9, %p759_p8 }
  0x51   :  { %p762_p11 = pnand %p761_p10, %p755_p7 }
  0x53   :  { %765 = shalt.err (!%p762_p11)
}
  0x54   :  { %s827_s2 = smov 128   ;;  %s828_s20 = smov 8  }
  0x55   :  { %71 = dma.hbm_to_vmem [thread:$0]  %s983_s4, 2048, %s66_s13, [#allocation9], %s827_s2, %s827_s2, %s828_s20  }
  0x56   :  { %s829_s3 = smov [#allocation11]   ;;  %s766_s11 = scalar_lea.hbm %s984_s5, 2048 }
  0x57   :  { %s77_s8 = sshll.u32 %s829_s3, 4  ;;  %p767_p12 = scmp.ne.s32.totalorder %s984_s5, %s766_s11  ;;  %s78_s8 = int_to_ptr.vmem [resolvable:$true] %s77_s8 }
  0x58   :  { %p770_p13 = scmp.lt.u32.totalorder %s766_s11, %s984_s5 }
  0x5a   :  { %p772_p0 = pnand %p770_p13, %p767_p12 }
  0x5c   :  { %775 = shalt.err (!%p772_p0)
}
  0x5d   :  { %s776_s18 = scalar_lea.vmem %s78_s8, 2048  ;;  %p781_p2 = scmp.lt.s32.totalorder %s78_s8, %s78_s8 }
  0x5e   :  { %p777_p1 = scmp.ne.s32.totalorder %s78_s8, %s776_s18  ;;  %p782_p3 = scmp.lt.s32.totalorder %s776_s18, %s776_s18 }
  0x60   :  { %p783_p4 = por %p782_p3, %p781_p2 }
  0x62   :  { %p784_p5 = pnand %p783_p4, %p777_p1 }
  0x64   :  { %787 = shalt.err (!%p784_p5)
}
  0x65   :  { %83 = dma.hbm_to_vmem [thread:$0]  %s984_s5, 2048, %s78_s8, [#allocation12], %s827_s2, %s827_s2, %s828_s20  }
  0x66   :  { %810 = dma.done.wait [#allocation3], 128  }
  0x67   :  { %811 = vsyncadd [#allocation3], 4294967168 }
  0x68   :  { %812 = dma.done.wait [#allocation6], 640  }
  0x69   :  { %813 = vsyncadd [#allocation6], 4294966656 }
  0x6a   :  { %814 = dma.done.wait [#allocation9], 2560  }
  0x6b   :  { %815 = vsyncadd [#allocation9], 4294964736 }
  0x6c   :  { %816 = dma.done.wait [#allocation12], 2048  }
  0x6d   :  { %817 = vsyncadd [#allocation12], 4294965248  ;;  %v830_v0 = vmov 0.0   ;;  %v104_v1 = vld [vmem:[#allocation7 + $0x8] sm:$0xff]  ;;  %v106_v2 = vld [vmem:[#allocation7 + $0x18] sm:$0xff]  ;;  %vm107_vm0 = vcmask 130048  }
  0x6e   :  { %175 = vmatprep.mubr.f32.mxu0 %v830_v0  ;;  %254 = vmatprep.mubr.f32.mxu1 %v830_v0  ;;  %v184_v3 = vld [vmem:[#allocation8 + $0x8] sm:$0xff]  ;;  %v581_v4 = vpack.c.bf16 %v106_v2, %v104_v1  ;;  %v186_v5 = vld [vmem:[#allocation8 + $0x18] sm:$0xff]  ;;  %v103_v6 = vld [vmem:[#allocation7] sm:$0xff]  ;;  %v831_v20 = vmov 0.0|0.0   ;;  %vm832_vm1 = vmmov 0   ;;  %s833_s5 = smov [#allocation13]  }
  0x6f   :  { %v105_v7 = vld [vmem:[#allocation7 + $0x10] sm:$0xff]  ;;  %v585_v8 = vpack.c.bf16 %v186_v5, %v184_v3  ;;  %v183_v10 = vld [vmem:[#allocation8] sm:$0xff]  ;;  %v182_v14 = vld [vmem:[#allocation5] sm:$0xff]  ;;  %s463_s19 = sshll.u32 %s833_s5, 4  ;;  %s464_s19 = int_to_ptr.vmem [resolvable:$true] %s463_s19 }
  0x70   :  { %v583_v9 = vpack.c.bf16 %v105_v7, %v103_v6  ;;  %v185_v11 = vld [vmem:[#allocation8 + $0x10] sm:$0xff]  ;;  %582 = vmatprep.subr.bf16.mxu0 %v581_v4  ;;  %v300_v15 = vld [vmem:[#allocation11] sm:$0xff]  ;;  %v301_v16 = vld [vmem:[#allocation11 + $0x8] sm:$0xff]  ;;  %s788_s1 = scalar_lea.vmem %s464_s19, 128  ;;  %p793_p7 = scmp.lt.s32.totalorder %s464_s19, %s464_s19 }
  0x71   :  { %v587_v12 = vpack.c.bf16 %v185_v11, %v183_v10  ;;  %586 = vmatprep.subr.bf16.mxu1 %v585_v8  ;;  %v102_v13 = vld [vmem:[#allocation2] sm:$0xff]  ;;  %v284_v17 = vld [vmem:[#allocation10] sm:$0xff]  ;;  %v590_v18 = vpack.c.bf16 %v301_v16, %v300_v15  ;;  %v285_v19 = vld [vmem:[#allocation10 + $0x8] sm:$0xff]  ;;  %p789_p6 = scmp.ne.s32.totalorder %s464_s19, %s788_s1  ;;  %p794_p8 = scmp.lt.s32.totalorder %s788_s1, %s788_s1 }
  0x72   :  { %584 = vmatpush1.bf16.msra.mxu0 %v583_v9  ;;  %v614_v21 = vpack.c.bf16 %v285_v19, %v284_v17  ;;  %v302_v22 = vld [vmem:[#allocation11 + $0x10] sm:$0xff]  ;;  %v303_v23 = vld [vmem:[#allocation11 + $0x18] sm:$0xff]  ;;  %v304_v28 = vld [vmem:[#allocation11 + $0x20] sm:$0xff] }
  0x73   :  { %588 = vmatpush1.bf16.msra.mxu1 %v587_v12  ;;  %613 = vmatprep.subr.bf16.mxu0 %v831_v20  ;;  %v286_v24 = vld [vmem:[#allocation10 + $0x10] sm:$0xff]  ;;  %v593_v25 = vpack.c.bf16 %v303_v23, %v302_v22  ;;  %v287_v26 = vld [vmem:[#allocation10 + $0x18] sm:$0xff]  ;;  %v305_v29 = vld [vmem:[#allocation11 + $0x28] sm:$0xff]  ;;  %p795_p9 = por %p794_p8, %p793_p7 }
  0x74   :  { %589 = vmatprep.subr.bf16.mxu1 %v831_v20  ;;  %v617_v27 = vpack.c.bf16 %v287_v26, %v286_v24  ;;  %v288_v30 = vld [vmem:[#allocation10 + $0x20] sm:$0xff]  ;;  %v596_v31 = vpack.c.bf16 %v305_v29, %v304_v28  ;;  %v289_v32 = vld [vmem:[#allocation10 + $0x28] sm:$0xff]  ;;  %v306_v34 = vld [vmem:[#allocation11 + $0x30] sm:$0xff] }
  0x75   :  { %475 = vmatmul.mubr.msk.f32.vlgmr.msra.gmra.mrb[0].mxu0 %vm107_vm0, %v102_v13  ;;  %v620_v33 = vpack.c.bf16 %v289_v32, %v288_v30  ;;  %v307_v35 = vld [vmem:[#allocation11 + $0x38] sm:$0xff]  ;;  %v290_v36 = vld [vmem:[#allocation10 + $0x30] sm:$0xff]  ;;  %v308_v40 = vld [vmem:[#allocation11 + $0x40] sm:$0xff]  ;;  %p796_p10 = pnand %p795_p9, %p789_p6 }
  0x76   :  { %476 = vmatmul.mubr.msk.f32.vlgmr.msra.gmra.mrb[0].mxu1 %vm107_vm0, %v182_v14  ;;  %615 = vmatpush3.bf16.msra.mxu0 %v614_v21  ;;  %v599_v37 = vpack.c.bf16 %v307_v35, %v306_v34  ;;  %v291_v38 = vld [vmem:[#allocation10 + $0x38] sm:$0xff]  ;;  %v309_v41 = vld [vmem:[#allocation11 + $0x48] sm:$0xff]  ;;  %v292_v42 = vld [vmem:[#allocation10 + $0x40] sm:$0xff] }
  0x77   :  { %591 = vmatpush3.bf16.msra.mxu1 %v590_v18  ;;  %616 = vmatprep.subr.bf16.mxu0 %v831_v20  ;;  %v623_v39 = vpack.c.bf16 %v291_v38, %v290_v36  ;;  %v602_v43 = vpack.c.bf16 %v309_v41, %v308_v40  ;;  %v293_v44 = vld [vmem:[#allocation10 + $0x48] sm:$0xff]  ;;  %v310_v46 = vld [vmem:[#allocation11 + $0x50] sm:$0xff]  ;;  %v311_v47 = vld [vmem:[#allocation11 + $0x58] sm:$0xff] }
  0x78   :  { %592 = vmatprep.subr.bf16.mxu1 %v831_v20  ;;  %v626_v45 = vpack.c.bf16 %v293_v44, %v292_v42  ;;  %v294_v48 = vld [vmem:[#allocation10 + $0x50] sm:$0xff]  ;;  %v605_v49 = vpack.c.bf16 %v311_v47, %v310_v46  ;;  %v295_v50 = vld [vmem:[#allocation10 + $0x58] sm:$0xff]  ;;  %v312_v52 = vld [vmem:[#allocation11 + $0x60] sm:$0xff]  ;;  %543 = vmatprep.mubr.msk.f32.mxu1 %vm832_vm1, %v830_v0 }
  0x79   :  { %v629_v51 = vpack.c.bf16 %v295_v50, %v294_v48  ;;  %v313_v53 = vld [vmem:[#allocation11 + $0x68] sm:$0xff]  ;;  %v296_v54 = vld [vmem:[#allocation10 + $0x60] sm:$0xff]  ;;  %v314_v58 = vld [vmem:[#allocation11 + $0x70] sm:$0xff]  ;;  %578 = vmatprep.mubr.msk.f32.mxu0 %vm832_vm1, %v830_v0 }
  0x7a   :  { %618 = vmatpush3.bf16.msra.mxu0 %v617_v27  ;;  %v608_v55 = vpack.c.bf16 %v313_v53, %v312_v52  ;;  %v297_v56 = vld [vmem:[#allocation10 + $0x68] sm:$0xff]  ;;  %v315_v59 = vld [vmem:[#allocation11 + $0x78] sm:$0xff]  ;;  %v298_v60 = vld [vmem:[#allocation10 + $0x70] sm:$0xff] }
  0x7b   :  { %594 = vmatpush3.bf16.msra.mxu1 %v593_v25  ;;  %619 = vmatprep.subr.bf16.mxu0 %v831_v20  ;;  %v632_v57 = vpack.c.bf16 %v297_v56, %v296_v54  ;;  %v611_v61 = vpack.c.bf16 %v315_v59, %v314_v58  ;;  %v299_v62 = vld [vmem:[#allocation10 + $0x78] sm:$0xff] }
  0x7c   :  { %595 = vmatprep.subr.bf16.mxu1 %v831_v20  ;;  %v635_v63 = vpack.c.bf16 %v299_v62, %v298_v60 }
  0x7e   :  { %621 = vmatpush3.bf16.msra.mxu0 %v620_v33 }
  0x7f   :  { %597 = vmatpush3.bf16.msra.mxu1 %v596_v31  ;;  %622 = vmatprep.subr.bf16.mxu0 %v831_v20 }
  0x80   :  { %598 = vmatprep.subr.bf16.mxu1 %v831_v20 }
  0x82   :  { %624 = vmatpush3.bf16.msra.mxu0 %v623_v39 }
  0x83   :  { %600 = vmatpush3.bf16.msra.mxu1 %v599_v37  ;;  %625 = vmatprep.subr.bf16.mxu0 %v831_v20 }
  0x84   :  { %601 = vmatprep.subr.bf16.mxu1 %v831_v20 }
  0x86   :  { %627 = vmatpush3.bf16.msra.mxu0 %v626_v45 }
  0x87   :  { %603 = vmatpush3.bf16.msra.mxu1 %v602_v43  ;;  %628 = vmatprep.subr.bf16.mxu0 %v831_v20 }
  0x88   :  { %604 = vmatprep.subr.bf16.mxu1 %v831_v20 }
  0x8a   :  { %630 = vmatpush3.bf16.msra.mxu0 %v629_v51 }
  0x8b   :  { %606 = vmatpush3.bf16.msra.mxu1 %v605_v49  ;;  %631 = vmatprep.subr.bf16.mxu0 %v831_v20 }
  0x8c   :  { %607 = vmatprep.subr.bf16.mxu1 %v831_v20 }
  0x8e   :  { %633 = vmatpush3.bf16.msra.mxu0 %v632_v57 }
  0x8f   :  { %609 = vmatpush3.bf16.msra.mxu1 %v608_v55  ;;  %634 = vmatprep.subr.bf16.mxu0 %v831_v20 }
  0x90   :  { %610 = vmatprep.subr.bf16.mxu1 %v831_v20 }
  0x92   :  { %636 = vmatpush3.bf16.msra.mxu0 %v635_v63 }
  0x93   :  { %612 = vmatpush3.bf16.msra.mxu1 %v611_v61 }
 0x148   :  { %v177_v1 = vpop.f32.mrb[0].mxu0 }
 0x149   :  { %v256_v2 = vpop.f32.mrb[0].mxu1  ;;  %v179_v3 = vpop.f32.mrb[1].mxu0 }
 0x14a   :  { %v261_v4 = vmul.f32 %v256_v2, %v177_v1  ;;  %v264_v5 = vmul.f32 %v256_v2, %v179_v3  ;;  %v258_v6 = vpop.f32.mrb[1].mxu1 }
 0x14b   :  { %v262_v7 = vmul.f32 %v258_v6, %v179_v3  ;;  %v265_v8 = vmul.f32 %v258_v6, %v177_v1 }
 0x14d   :  { %v263_v9 = vadd.f32 %v262_v7, %v261_v4  ;;  %v266_v10 = vsub.f32 %v264_v5, %v265_v8 }
 0x14f   :  { %v267_v11 = vmul.f32 %v263_v9, %v263_v9  ;;  %v268_v12 = vmul.f32 %v266_v10, %v266_v10 }
 0x151   :  { %v269_v13 = vadd.f32 %v268_v12, %v267_v11 }
 0x153   :  { %652 = vrsqrt.f32 %v269_v13  ;;  %vm272_vm2 = vcmp.eq.f32.partialorder %v269_v13, inf  ;;  %v275_v16 = vand.u32 2147483648, %v269_v13  ;;  %vm274_vm3 = vcmp.eq.f32.partialorder %v269_v13, 0.0 }
 0x15d   :  { %v653_v14 = vpop.eup %652 }
 0x15e   :  { %v271_v15 = vmul.f32 %v653_v14, %v269_v13 }
 0x160   :  { %v273_v17 = vsel %vm272_vm2, %v269_v13, %v271_v15 }
 0x161   :  { %v276_v0 = vsel %vm274_vm3, %v275_v16, %v273_v17 }
 0x162   :  { %v277_v18 = vadd.f32 0.001, %v276_v0 }
 0x164   :  { %654 = vrcp.f32 %v277_v18 }
 0x16e   :  { %v655_v19 = vpop.eup %654 }
 0x16f   :  { %v279_v20 = vmul.f32 %v655_v19, %v277_v18 }
 0x171   :  { %v280_v21 = vsub.f32 2.0, %v279_v20 }
 0x173   :  { %v281_v22 = vmul.f32 %v655_v19, %v280_v21 }
 0x175   :  { %v282_v23 = vmul.f32 %v281_v22, %v263_v9  ;;  %v283_v24 = vmul.f32 %v281_v22, %v266_v10 }
 0x177   :  { %544 = vmatmul.mubr.f32.vlgmr.msra.gmra.mrb[2].mxu1 %v283_v24  ;;  %579 = vmatmul.mubr.f32.vlgmr.msra.gmra.mrb[2].mxu0 %v282_v23 }
 0x24a   :  { %v382_v25 = vpop.f32.mrb[2].mxu1  ;;  %v452_v26 = vpop.f32.mrb[2].mxu0 }
 0x24b   :  { %v453_v27 = vadd.f32 %v452_v26, %v382_v25  ;;  %v545_v28 = vpop.f32.mrb[3].mxu1  ;;  %v580_v29 = vpop.f32.mrb[3].mxu0 }
 0x24d   :  { %456 = vst [vmem:[#allocation13] sm:$0xff] %v453_v27 }
 0x24e   :  { %799 = shalt.err (!%p796_p10)
}
 0x24f   :  { %s800_s22 = scalar_lea.hbm %s985_s6, 128 }
 0x250   :  { %p801_p11 = scmp.ne.s32.totalorder %s985_s6, %s800_s22  ;;  %p804_p12 = scmp.lt.u32.totalorder %s800_s22, %s985_s6 }
 0x252   :  { %p806_p13 = pnand %p804_p12, %p801_p11 }
 0x254   :  { %809 = shalt.err (!%p806_p13)
}
 0x255   :  { %466 = dma.vmem_to_hbm [thread:$0]  %s464_s19, 128, %s985_s6, [#allocation4]  }
 0x256   :  { %818 = dma.done.wait [#allocation4], 128  }
 0x257   :  { %819 = vsyncadd [#allocation4], 4294967168 }
 0x258   :  { %470 = vsyncpa [#allocation3], 1 }
 0x259   :  { %471 = vsyncpa [#allocation6], 1 }
 0x25a   :  { %472 = vsyncpa [#allocation9], 1 }
 0x25b   :  { %473 = vsyncpa [#allocation12], 1 }
 0x25c   :  { %474 = vsyncpa [#allocation4], 1 }

</bundles_post_ra>
